<compile_context>
chip_gen: v6e
topology: v6e:2x2x1
jax: 0.10.0
libtpu: 0.0.40
codegen_flags: <defaults>
</compile_context>

<pallas_src>
import functools

import jax
import jax.numpy as jnp
from jax.experimental import pallas as pl
from jax.experimental.pallas import tpu as pltpu


def patch_embed_kernel(patches_ref, w_ref, pos_ref, out_ref, *, m_tile, bpb):
    # patches_ref: (m_tile, K_pad)   bf16/f32 flattened patch rows
    # w_ref:       (K_pad, E_pad)    reshaped conv weight (resident, fetched once)
    # pos_ref:     (m_tile*bpb, E_pad) position embeddings + folded conv bias
    #                                 (resident, fetched once)
    # out_ref:     (m_tile, E_pad)
    emb = jnp.dot(patches_ref[...], w_ref[...],
                  preferred_element_type=jnp.float32)           # MXU, fp32 acc
    if bpb > 1:
        # tile lies inside one batch element; pick its rows of the resident pos
        s = pl.multiple_of((pl.program_id(0) % bpb) * m_tile, m_tile)
        pos = pos_ref[pl.ds(s, m_tile), :]
    else:
        pos = pos_ref[...]
    out_ref[...] = (emb + pos).astype(out_ref.dtype)            # single VPU add
    # TODO(synk): dropout is identity here (eval mode / p=0.0); no RNG applied.


def _pick_m_tile(batch, n, target=256):
    """Choose the flattened-row tile size.

    Returns (m_tile, bpb) where bpb = tiles per batch element (bpb == 1 means a
    tile spans one or more whole batch elements and pos is pre-tiled in the
    wrapper)."""
    m = batch * n
    if m <= target:
        return m, 1                       # one tile covers everything
    if n <= target:
        # k whole batch elements per tile; k must divide batch
        k = max(target // n, 1)
        while k > 1 and batch % k:
            k -= 1
        return k * n, 1
    # n > target: tile within a batch element; prefer 8-aligned divisors of n
    t = target - (target % 8)
    while t >= 8:
        if n % t == 0:
            return t, n // t
        t -= 8
    # TODO(synk): n has no 8-aligned divisor <= target; whole-sequence tiles
    # may emit masked stores when n % 8 != 0.
    return n, 1


def patch_embeddings(x, conv_w, conv_b, cls_token, pos_emb, patch_size,
                     *, use_bf16=True, tile_target=256, out_dtype=jnp.float32):
    """x: (B, C, H, W) -> (B, num_patches + 1, E), matching the PyTorch module."""
    B, C, H, W = x.shape
    P = patch_size
    nH, nW = H // P, W // P
    N = nH * nW
    E = conv_w.shape[0]
    K = C * P * P
    M = B * N

    # The PyTorch module's cat + position broadcast is only valid when the
    # cls_token contributes exactly one sequence row (num_channels == 1).
    assert cls_token.shape[1] == 1, "module semantics require num_channels == 1"

    compute_dtype = jnp.bfloat16 if use_bf16 else x.dtype
    xs = x.astype(compute_dtype)      # cast BEFORE patchify -> half-width pass

    # --- patch extraction, features ordered (c, ph, pw) to match conv weight ---
    # TODO(synk): could be fused into the kernel with a per-patch-row BlockSpec
    # on the raw NCHW input if profiling shows this XLA pass is not hidden.
    patches = xs.reshape(B, C, nH, P, nW, P).transpose(0, 2, 4, 1, 3, 5)
    patches = patches.reshape(M, K)                            # (B*N, K)

    # --- wrapper-side prep (done once) ---
    w2d = conv_w.reshape(E, K).T.astype(compute_dtype)         # (K, E)
    # fold conv bias into the patch-row position embeddings -> one in-kernel add
    pos_patch = pos_emb[0, 1:, :] + conv_b[None, :]            # (N, E) fp32
    # cls row never goes through the conv; handled entirely outside the kernel
    cls_row = cls_token[0, 0, :] + pos_emb[0, 0, :]            # (E,)

    # --- lane-dense padding: E (output lanes) and K (contraction) to 128 ---
    E_pad = ((E + 127) // 128) * 128
    K_pad = ((K + 127) // 128) * 128
    if K_pad != K:
        patches = jnp.pad(patches, ((0, 0), (0, K_pad - K)))   # zeros: exact
        w2d = jnp.pad(w2d, ((0, K_pad - K), (0, 0)))
    if E_pad != E:
        w2d = jnp.pad(w2d, ((0, 0), (0, E_pad - E)))
        pos_patch = jnp.pad(pos_patch, ((0, 0), (0, E_pad - E)))

    m_tile, bpb = _pick_m_tile(B, N, tile_target)
    if bpb == 1 and m_tile > N:
        # one tile spans m_tile // N whole batch elements: pre-tile pos once
        pos_res = jnp.tile(pos_patch, (m_tile // N, 1))        # (m_tile, E_pad)
    else:
        pos_res = pos_patch                                    # (m_tile*bpb, E_pad)

    grid = (M // m_tile,)

    out = pl.pallas_call(
        functools.partial(patch_embed_kernel, m_tile=m_tile, bpb=bpb),
        out_shape=jax.ShapeDtypeStruct((M, E_pad), out_dtype),
        grid_spec=pltpu.PrefetchScalarGridSpec(
            num_scalar_prefetch=0,
            grid=grid,
            in_specs=[
                pl.BlockSpec((m_tile, K_pad), lambda m: (m, 0)),
                # resident reshaped conv weight (bf16 halves its VMEM footprint;
                # pipeline_mode=pl.Buffered(1) could single-buffer it on v7x)
                pl.BlockSpec((K_pad, E_pad), lambda m: (0, 0)),
                # resident position embeddings (+bias): DMA'd from HBM once
                pl.BlockSpec(pos_res.shape, lambda m: (0, 0)),
            ],
            out_specs=pl.BlockSpec((m_tile, E_pad), lambda m: (m, 0)),
        ),
        compiler_params=pltpu.CompilerParams(
            dimension_semantics=("parallel",)),
    )(patches, w2d, pos_res)

    out = out.reshape(B, N, E_pad)
    if E_pad != E:                       # no-op when E is already 128-aligned
        out = out[..., :E]
    cls_rows = jnp.broadcast_to(
        cls_row.astype(out_dtype).reshape(1, 1, E), (B, 1, E))
    return jnp.concatenate([cls_rows, out], axis=1)            # (B, N+1, E)


def reference(x, conv_w, conv_b, cls_token, pos_emb, patch_size):
    """Pure-JAX fp32 reference mirroring the PyTorch forward."""
    B = x.shape[0]
    E = conv_w.shape[0]
    y = jax.lax.conv_general_dilated(
        x, conv_w,
        window_strides=(patch_size, patch_size),
        padding="VALID",
        dimension_numbers=("NCHW", "OIHW", "NCHW"),
    ) + conv_b.reshape(1, E, 1, 1)
    B_, E_, nH, nW = y.shape
    y = y.reshape(B_, E_, nH * nW).transpose(0, 2, 1)          # (B, N, E)
    cls = jnp.broadcast_to(cls_token, (B,) + cls_token.shape[1:])
    y = jnp.concatenate([cls, y], axis=1)
    return pos_emb + y


if __name__ == "__main__":
    # config: num_channels must be 1 for the module's cls_token/position
    # broadcasting to be valid (cls_token has shape (1, num_channels, E)).
    img_size = 16
    patch_size = 4
    num_channels = 1
    embed_dim = 32
    batch = 2
    num_patches = (img_size // patch_size) ** 2

    key = jax.random.PRNGKey(0)
    kx, kw, kb, kc, kp = jax.random.split(key, 5)

    x = jax.random.normal(kx, (batch, num_channels, img_size, img_size),
                          dtype=jnp.float32)
    conv_w = jax.random.normal(
        kw, (embed_dim, num_channels, patch_size, patch_size),
        dtype=jnp.float32) * 0.1
    conv_b = jax.random.normal(kb, (embed_dim,), dtype=jnp.float32) * 0.1
    cls_token = jax.random.normal(kc, (1, num_channels, embed_dim),
                                  dtype=jnp.float32)
    pos_emb = jax.random.normal(kp, (1, num_patches + 1, embed_dim),
                                dtype=jnp.float32)

    ref = reference(x, conv_w, conv_b, cls_token, pos_emb, patch_size)

    # Default bf16 MXU path (fp32 accumulation) -- relaxed tolerance.
    out = patch_embeddings(x, conv_w, conv_b, cls_token, pos_emb, patch_size)
    out = jax.block_until_ready(out)
    assert out.shape == (batch, num_patches + 1, embed_dim), out.shape
    assert jnp.allclose(out, ref, atol=3e-2, rtol=3e-2), \
        float(jnp.max(jnp.abs(out - ref)))

    # Exact fp32 path still available -- tight tolerance.
    out32 = jax.block_until_ready(
        patch_embeddings(x, conv_w, conv_b, cls_token, pos_emb, patch_size,
                         use_bf16=False))
    assert jnp.allclose(out32, ref, atol=1e-4, rtol=1e-4), \
        float(jnp.max(jnp.abs(out32 - ref)))

    print("KERNEL_OK")
</pallas_src>

<mosaic_0001>
module attributes {stable_mosaic.version = 11 : i64} {
  func.func @patch_embed_kernel(%arg0: i32, %arg1: memref<32x128xbf16, #tpu.memory_space<vmem>>, %arg2: memref<128x128xbf16, #tpu.memory_space<vmem>>, %arg3: memref<32x128xf32, #tpu.memory_space<vmem>>, %arg4: memref<32x128xf32, #tpu.memory_space<vmem>>) attributes {dimension_semantics = [#tpu.dimension_semantics<parallel>], iteration_bounds = array<i64: 1>, scalar_prefetch = 0 : i64, scratch_operands = 0 : i64, tpu.core_type = #tpu.core_type<tc>, window_params = [{transform_indices = @transform_0, window_bounds = array<i64: 32, 128>}, {pipeline_mode = #tpu.pipeline_mode<synchronous>, transform_indices = @transform_1, window_bounds = array<i64: 128, 128>}, {pipeline_mode = #tpu.pipeline_mode<synchronous>, transform_indices = @transform_2, window_bounds = array<i64: 32, 128>}, {transform_indices = @transform_3, window_bounds = array<i64: 32, 128>}]} {
    %c0 = arith.constant 0 : index
    %c0_0 = arith.constant 0 : index
    %0 = vector.load %arg1[%c0, %c0_0] : memref<32x128xbf16, #tpu.memory_space<vmem>>, vector<32x128xbf16>
    %c0_1 = arith.constant 0 : index
    %c0_2 = arith.constant 0 : index
    %1 = vector.load %arg2[%c0_1, %c0_2] : memref<128x128xbf16, #tpu.memory_space<vmem>>, vector<128x128xbf16>
    %cst = arith.constant dense<0.000000e+00> : vector<32x128xf32>
    %2 = tpu.matmul %0, %1, %cst {dimension_numbers = #tpu.dot_dimension_numbers<[1], [0], [0], [1], [0, 0, 1, 1], [], []>} : vector<32x128xbf16>, vector<128x128xbf16>, vector<32x128xf32> -> vector<32x128xf32>
    %c0_3 = arith.constant 0 : index
    %c0_4 = arith.constant 0 : index
    %3 = vector.load %arg3[%c0_3, %c0_4] : memref<32x128xf32, #tpu.memory_space<vmem>>, vector<32x128xf32>
    %4 = arith.addf %2, %3 : vector<32x128xf32>
    %c0_5 = arith.constant 0 : index
    %c0_6 = arith.constant 0 : index
    %5 = vector.load %arg4[%c0_5, %c0_6] : memref<32x128xf32, #tpu.memory_space<vmem>>, vector<32x128xf32>
    tpu.vector_store %arg4[%c0_5, %c0_6], %4 {strides = array<i32>} : memref<32x128xf32, #tpu.memory_space<vmem>>, vector<32x128xf32>,
    return
  }
  func.func @transform_0(%arg0: i32) -> (i32, i32) {
    %c0_i32 = arith.constant 0 : i32
    %c0_i32_0 = arith.constant 0 : i32
    return %arg0, %c0_i32 : i32, i32
  }
  func.func @transform_1(%arg0: i32) -> (i32, i32) {
    %c0_i32 = arith.constant 0 : i32
    %c0_i32_0 = arith.constant 0 : i32
    %c0_i32_1 = arith.constant 0 : i32
    return %c0_i32, %c0_i32_0 : i32, i32
  }
  func.func @transform_2(%arg0: i32) -> (i32, i32) {
    %c0_i32 = arith.constant 0 : i32
    %c0_i32_0 = arith.constant 0 : i32
    %c0_i32_1 = arith.constant 0 : i32
    return %c0_i32, %c0_i32_0 : i32, i32
  }
  func.func @transform_3(%arg0: i32) -> (i32, i32) {
    %c0_i32 = arith.constant 0 : i32
    %c0_i32_0 = arith.constant 0 : i32
    return %arg0, %c0_i32 : i32, i32
  }
}

</mosaic_0001>

<bundles_post_ra>
// kernel: tpu_custom_call.1
= control target key start
LH: loop header
LB: loop body
LE: loop exit
PB: predicated region body
PF: predicated region fallthrough
CT: control target
= control target key end

     0   :  { %8 = vsyncpa [#allocation3], 0  ;;  %s402_s0 = inlined_call_operand.hbm [shape: bf16[32,128], index: 0, kind: input, shape index: {}]   ;;  %s403_s1 = inlined_call_operand.hbm [shape: bf16[128,128], index: 1, kind: input, shape index: {}]   ;;  %s404_s2 = inlined_call_operand.hbm [shape: f32[32,128], index: 2, kind: input, shape index: {}]   ;;  %s405_s3 = inlined_call_operand.hbm [shape: f32[32,128], index: 3, kind: output, shape index: {}]  }
   0x1   :  { %9 = vsyncpa [#allocation6], 0 }
   0x2   :  { %10 = vsyncpa [#allocation4], 0  ;;  %s356_s12 = smov [#allocation5]   ;;  %s357_s14 = smov [#allocation2]  }
   0x3   :  { %s28_s13 = sshll.u32 %s356_s12, 4  ;;  %s16_s15 = sshll.u32 %s357_s14, 4  ;;  %s29_s13 = int_to_ptr.vmem [resolvable:$true] %s28_s13  ;;  %s17_s15 = int_to_ptr.vmem [resolvable:$true] %s16_s15 }
   0x4   :  { %s278_s16 = scalar_lea.vmem %s29_s13, 1024  ;;  %p283_p1 = scmp.lt.s32.totalorder %s29_s13, %s29_s13 }
   0x5   :  { %p279_p0 = scmp.ne.s32.totalorder %s29_s13, %s278_s16  ;;  %p284_p2 = scmp.lt.s32.totalorder %s278_s16, %s278_s16 }
   0x7   :  { %p285_p3 = por %p284_p2, %p283_p1 }
   0x9   :  { %p286_p4 = pnand %p285_p3, %p279_p0 }
   0xb   :  { %289 = shalt.err (!%p286_p4)
}
   0xc   :  { %s358_s17 = smov 64   ;;  %s359_s18 = smov 4  }
   0xd   :  { %34 = dma.hbm_to_vmem [thread:$0]  %s403_s1, 1024, %s29_s13, [#allocation6], %s358_s17, %s358_s17, %s359_s18  }
   0xe   :  { %s298_s21 = scalar_lea.vmem %s17_s15, 256  ;;  %p303_p6 = scmp.lt.s32.totalorder %s17_s15, %s17_s15 }
   0xf   :  { %p299_p5 = scmp.ne.s32.totalorder %s17_s15, %s298_s21  ;;  %p304_p7 = scmp.lt.s32.totalorder %s298_s21, %s298_s21 }
  0x11   :  { %p305_p8 = por %p304_p7, %p303_p6 }
  0x13   :  { %p306_p9 = pnand %p305_p8, %p299_p5 }
  0x15   :  { %309 = shalt.err (!%p306_p9)
}
  0x16   :  { %22 = dma.hbm_to_vmem [thread:$0]  %s402_s0, 256, %s17_s15, [#allocation3], %s358_s17, %s358_s17, %s359_s18  }
  0x17   :  { %s360_s24 = smov [#allocation7]  }
  0x18   :  { %s40_s25 = sshll.u32 %s360_s24, 4  ;;  %s41_s25 = int_to_ptr.vmem [resolvable:$true] %s40_s25 }
  0x19   :  { %s318_s26 = scalar_lea.vmem %s41_s25, 512  ;;  %p323_p11 = scmp.lt.s32.totalorder %s41_s25, %s41_s25 }
  0x1a   :  { %p319_p10 = scmp.ne.s32.totalorder %s41_s25, %s318_s26  ;;  %p324_p12 = scmp.lt.s32.totalorder %s318_s26, %s318_s26 }
  0x1c   :  { %p325_p13 = por %p324_p12, %p323_p11 }
  0x1e   :  { %p326_p0 = pnand %p325_p13, %p319_p10 }
  0x20   :  { %329 = shalt.err (!%p326_p0)
}
  0x21   :  { %s361_s1 = smov 128   ;;  %s362_s27 = smov 8  }
  0x22   :  { %46 = dma.hbm_to_vmem [thread:$0]  %s404_s2, 512, %s41_s25, [#allocation6], %s361_s1, %s361_s1, %s362_s27  }
  0x23   :  { %350 = dma.done.wait [#allocation3], 256  }
  0x24   :  { %351 = vsyncadd [#allocation3], 4294967040 }
  0x25   :  { %352 = dma.done.wait [#allocation6], 1536  }
  0x26   :  { %353 = vsyncadd [#allocation6], 4294965760  ;;  %v260_v0 = vld [vmem:[#allocation5 + $0x38] sm:$0xff]   ;;  %v261_v1 = vld [vmem:[#allocation5 + $0x30] sm:$0xff]   ;;  %s363_s0 = smov [#allocation8]  }
  0x27   :  { %232 = vmatprep.subr.bf16.mxu0 %v260_v0  ;;  %v262_v2 = vld [vmem:[#allocation5 + $0x28] sm:$0xff]   ;;  %v263_v3 = vld [vmem:[#allocation5 + $0x20] sm:$0xff]   ;;  %v268_v4 = vld [vmem:[#allocation2] sm:$0xff]   ;;  %s199_s2 = sshll.u32 %s363_s0, 4  ;;  %s200_s2 = int_to_ptr.vmem [resolvable:$true] %s199_s2 }
  0x28   :  { %233 = vmatpush3.bf16.msra.mxu0 %v260_v0  ;;  %248 = vmatprep.mubr.bf16.mxu0 %v268_v4  ;;  %v264_v5 = vld [vmem:[#allocation5 + $0x18] sm:$0xff]   ;;  %v265_v6 = vld [vmem:[#allocation5 + $0x10] sm:$0xff]   ;;  %v266_v7 = vld [vmem:[#allocation5 + $0x8] sm:$0xff]   ;;  %s330_s30 = scalar_lea.vmem %s200_s2, 512  ;;  %p335_p2 = scmp.lt.s32.totalorder %s200_s2, %s200_s2 }
  0x29   :  { %234 = vmatprep.subr.bf16.mxu0 %v261_v1  ;;  %v267_v8 = vld [vmem:[#allocation5] sm:$0xff]   ;;  %v269_v9 = vld [vmem:[#allocation2 + $0x8] sm:$0xff]   ;;  %v79_v10 = vld [vmem:[#allocation7 + $0x10] sm:$0xff]  ;;  %p331_p1 = scmp.ne.s32.totalorder %s200_s2, %s330_s30  ;;  %p336_p3 = scmp.lt.s32.totalorder %s330_s30, %s330_s30 }
  0x2a   :  { %v77_v12 = vld [vmem:[#allocation7] sm:$0xff]  ;;  %v80_v15 = vld [vmem:[#allocation7 + $0x18] sm:$0xff]  ;;  %v78_v18 = vld [vmem:[#allocation7 + $0x8] sm:$0xff] }
  0x2b   :  { %p337_p4 = por %p336_p3, %p335_p2 }
  0x2c   :  { %235 = vmatpush3.bf16.msra.mxu0 %v261_v1 }
  0x2d   :  { %236 = vmatprep.subr.bf16.mxu0 %v262_v2  ;;  %p338_p5 = pnand %p337_p4, %p331_p1 }
  0x30   :  { %237 = vmatpush3.bf16.msra.mxu0 %v262_v2 }
  0x31   :  { %238 = vmatprep.subr.bf16.mxu0 %v263_v3 }
  0x34   :  { %239 = vmatpush3.bf16.msra.mxu0 %v263_v3 }
  0x35   :  { %240 = vmatprep.subr.bf16.mxu0 %v264_v5 }
  0x38   :  { %241 = vmatpush3.bf16.msra.mxu0 %v264_v5 }
  0x39   :  { %242 = vmatprep.subr.bf16.mxu0 %v265_v6 }
  0x3c   :  { %243 = vmatpush3.bf16.msra.mxu0 %v265_v6 }
  0x3d   :  { %244 = vmatprep.subr.bf16.mxu0 %v266_v7 }
  0x40   :  { %245 = vmatpush3.bf16.msra.mxu0 %v266_v7 }
  0x41   :  { %246 = vmatprep.subr.bf16.mxu0 %v267_v8 }
  0x44   :  { %247 = vmatpush3.bf16.msra.mxu0 %v267_v8 }
  0x47   :  { %249 = vmatmul.mubr.bf16.vlgmr.msra.gmra.mxu0 %v269_v9 }
 0x107   :  { %v250_v11 = vpop.f32.mrf.mxu0 }
 0x108   :  { %v184_v13 = vadd.f32 %v250_v11, %v79_v10 }
 0x109   :  { %v175_v14 = vpop.f32.mrf.mxu0 }
 0x10a   :  { %192 = vst [vmem:[#allocation8 + $0x10] sm:$0xff] %v184_v13  ;;  %v176_v16 = vadd.f32 %v175_v14, %v77_v12 }
 0x10b   :  { %v251_v17 = vpop.f32.mrf.mxu0 }
 0x10c   :  { %190 = vst [vmem:[#allocation8] sm:$0xff] %v176_v16  ;;  %v187_v19 = vadd.f32 %v251_v17, %v80_v15 }
 0x10d   :  { %v178_v20 = vpop.f32.mrf.mxu0 }
 0x10e   :  { %193 = vst [vmem:[#allocation8 + $0x18] sm:$0xff] %v187_v19  ;;  %v179_v21 = vadd.f32 %v178_v20, %v78_v18 }
 0x110   :  { %191 = vst [vmem:[#allocation8 + $0x8] sm:$0xff] %v179_v21 }
 0x111   :  { %341 = shalt.err (!%p338_p5)
}
 0x112   :  { %205 = dma.vmem_to_hbm [thread:$0]  %s200_s2, 512, %s405_s3, [#allocation4], %s361_s1, %s361_s1, %s362_s27  }
 0x113   :  { %354 = dma.done.wait [#allocation4], 512  }
 0x114   :  { %355 = vsyncadd [#allocation4], 4294966784 }
 0x115   :  { %209 = vsyncpa [#allocation3], 1 }
 0x116   :  { %210 = vsyncpa [#allocation6], 1 }
 0x117   :  { %211 = vsyncpa [#allocation4], 1 }

</bundles_post_ra>
